<compile_context>
chip_gen: v7x
topology: tpu7x:2x2x1
jax: 0.10.0
libtpu: 0.0.40
codegen_flags: <defaults>
</compile_context>

<pallas_src>
import functools
import math

import jax
import jax.numpy as jnp
from jax.experimental import pallas as pl
from jax.experimental.pallas import tpu as pltpu


def _timestamp_embed_kernel(t_ref, e_ref, b_ref, o_ref, *, use_matmul):
    # t_ref: (tm, G)  packed timestamp rows (G original rows per output row)
    # e_ref: (G, L)   expansion matrix E = I_G (kron) w^T
    # b_ref: (1, L)   bias tiled G times along lanes
    # o_ref: (tm, L)  lane-dense output block
    t = t_ref[...]
    e = e_ref[...]
    b = b_ref[...]
    if use_matmul:
        # (tm, G) @ (G, L): expands each timestamp across its h_dim lanes and
        # multiplies by w in one MXU op; fully hidden under the output DMA.
        y = jnp.dot(t, e, preferred_element_type=jnp.float32) + b
    else:
        # G == 1 fallback: plain broadcast FMA on the VPU.
        y = t * e + b
    o_ref[...] = y.astype(o_ref.dtype)


def _round_up(x, m):
    return ((x + m - 1) // m) * m


def _choose_packing(M, h_dim, *, target_lanes=1024, lane_cap=4096):
    """Pick G (original rows packed per lane-dense output row) and L = G*h_dim."""
    g0 = 128 // math.gcd(h_dim, 128)     # minimal G making L a multiple of 128
    if g0 * h_dim > lane_cap:
        # Lane-dense packing would need an enormous L (e.g. large prime h_dim);
        # fall back to G = 1 (masked stores, still correct).
        return 1, h_dim
    k = max(1, min(target_lanes // (g0 * h_dim), lane_cap // (g0 * h_dim)))
    g_pref = g0 * k
    # Prefer the largest multiple of g0 (<= g_pref) that divides M exactly so
    # no tail padding and no post-kernel slice copy are needed.
    g = g_pref
    while g >= g0:
        if M % g == 0:
            return g, g * h_dim
        g -= g0
    return g_pref, g_pref * h_dim


def timestamp_embedding(timestamps, weight, bias, *, tm=2048,
                        out_dtype=jnp.float32):
    """timestamps: (B, S) float
       weight:     (h_dim, 1)  (PyTorch nn.Linear weight layout)
       bias:       (h_dim,)
       returns:    (B, S, h_dim) in `out_dtype`.  float32 matches nn.Linear;
                   jnp.bfloat16 halves HBM write traffic (the op's roofline).
    """
    B, S = timestamps.shape
    h_dim = weight.shape[0]
    M = B * S

    G, L = _choose_packing(M, h_dim)
    out_itemsize = jnp.dtype(out_dtype).itemsize
    sub = {4: 8, 2: 16, 1: 32}.get(out_itemsize, 8)   # sublane granularity

    rows_needed = pl.cdiv(M, G)
    m_pad = rows_needed * G          # == M whenever G divides M (usual case)

    # ---- VMEM accounting (per buffer) ----------------------------------------
    in_lanes = _round_up(G, 128)     # (tm, G) input block is lane-padded in VMEM
    per_row_bytes = L * out_itemsize + in_lanes * 4

    # ---- Row-tile selection ----------------------------------------------------
    if rows_needed <= sub:
        tm = rows_needed             # single block equal to the full first dim
    else:
        tm = _round_up(max(sub, min(tm, rows_needed)), sub)
        # Keep >= ~4 grid steps: lets the double-buffer pipeline reach steady
        # state and lets the "parallel" axis span both v7x TensorCores.
        min_steps = 4
        tm = min(tm, _round_up(pl.cdiv(rows_needed, min_steps), sub))
        # Honest VMEM budget for the double-buffered (input + output) tiles.
        tile_budget = 16 * 1024 * 1024
        tm_budget = max(sub, (tile_budget // (2 * per_row_bytes)) // sub * sub)
        tm = max(sub, min(tm, tm_budget))

    grid = pl.cdiv(rows_needed, tm)  # ragged last block is masked by Pallas

    # ---- Wrapper-side layout plumbing (cheap: h_dim x smaller than output) ----
    t_flat = timestamps.reshape(M).astype(jnp.float32)
    if m_pad != M:
        t_flat = jnp.pad(t_flat, (0, m_pad - M))   # <= G-1 rows, rare
    t_packed = t_flat.reshape(rows_needed, G)

    w_row = weight.reshape(1, h_dim).astype(jnp.float32)
    # E = I_G (kron) w_row : E[g, g*h_dim + h] = W[h, 0]
    e_mat = jnp.kron(jnp.eye(G, dtype=jnp.float32), w_row)            # (G, L)
    b_tiled = jnp.tile(bias.reshape(h_dim).astype(jnp.float32), (G,)).reshape(1, L)

    kernel = functools.partial(_timestamp_embed_kernel, use_matmul=(G > 1))

    tile_bytes = 2 * tm * per_row_bytes
    resident_bytes = (G * L + L) * 4
    vmem_limit = max(32 * 1024 * 1024,
                     int(tile_bytes + resident_bytes + (4 << 20)))

    out_packed = pl.pallas_call(
        kernel,
        out_shape=jax.ShapeDtypeStruct((rows_needed, L), out_dtype),
        grid_spec=pltpu.PrefetchScalarGridSpec(
            num_scalar_prefetch=0,
            grid=(grid,),
            in_specs=[
                pl.BlockSpec((tm, G), lambda i: (i, 0)),   # packed timestamps
                pl.BlockSpec((G, L), lambda i: (0, 0)),    # expansion (resident)
                pl.BlockSpec((1, L), lambda i: (0, 0)),    # bias (resident)
            ],
            out_specs=pl.BlockSpec((tm, L), lambda i: (i, 0)),
        ),
        compiler_params=pltpu.CompilerParams(
            dimension_semantics=("parallel",),
            vmem_limit_bytes=vmem_limit,
        ),
        cost_estimate=pl.CostEstimate(
            flops=2 * M * h_dim,
            transcendentals=0,
            bytes_accessed=4 * (m_pad + G * L + L) + M * h_dim * out_itemsize,
        ),
    )(t_packed, e_mat, b_tiled)

    # Packed row r holds original rows r*G .. r*G+G-1 concatenated.
    out_flat = out_packed.reshape(m_pad, h_dim)
    if m_pad != M:
        out_flat = out_flat[:M]      # only when M % G != 0 (tiny pad)
    return out_flat.reshape(B, S, h_dim)


if __name__ == "__main__":
    key = jax.random.PRNGKey(0)

    def ref_embed(ts, w, b):
        h = w.shape[0]
        return ts[..., None] * w.reshape(1, 1, h) + b.reshape(1, 1, h)

    # --- Test 1: batch=2, seq=8, h_dim=32 (lane-dense packed path, G divides M)
    B, S, H = 2, 8, 32
    k_t, k_w, k_b = jax.random.split(key, 3)
    timestamps = jax.random.uniform(k_t, (B, S), dtype=jnp.float32) * 10.0
    bound = 1.0 / math.sqrt(1.0)   # nn.Linear(1, H) default init range
    weight = jax.random.uniform(k_w, (H, 1), dtype=jnp.float32,
                                minval=-bound, maxval=bound)
    bias = jax.random.uniform(k_b, (H,), dtype=jnp.float32,
                              minval=-bound, maxval=bound)
    out = jax.block_until_ready(timestamp_embedding(timestamps, weight, bias))
    assert out.shape == (B, S, H)
    assert jnp.allclose(out, ref_embed(timestamps, weight, bias),
                        atol=1e-5, rtol=1e-5)

    # --- Test 2: h_dim=96 (neither divides nor multiple of 128), M % G != 0
    B2, S2, H2 = 3, 5, 96
    k_t2, k_w2, k_b2 = jax.random.split(jax.random.PRNGKey(1), 3)
    ts2 = jax.random.uniform(k_t2, (B2, S2), dtype=jnp.float32) * 10.0
    w2 = jax.random.uniform(k_w2, (H2, 1), dtype=jnp.float32, minval=-1.0, maxval=1.0)
    b2 = jax.random.uniform(k_b2, (H2,), dtype=jnp.float32, minval=-1.0, maxval=1.0)
    out2 = jax.block_until_ready(timestamp_embedding(ts2, w2, b2))
    assert out2.shape == (B2, S2, H2)
    assert jnp.allclose(out2, ref_embed(ts2, w2, b2), atol=1e-5, rtol=1e-5)

    # --- Test 3: h_dim=128 (multiple of 128), multi-step grid
    B3, S3, H3 = 2, 64, 128
    k_t3, k_w3, k_b3 = jax.random.split(jax.random.PRNGKey(2), 3)
    ts3 = jax.random.uniform(k_t3, (B3, S3), dtype=jnp.float32) * 10.0
    w3 = jax.random.uniform(k_w3, (H3, 1), dtype=jnp.float32, minval=-1.0, maxval=1.0)
    b3 = jax.random.uniform(k_b3, (H3,), dtype=jnp.float32, minval=-1.0, maxval=1.0)
    out3 = jax.block_until_ready(timestamp_embedding(ts3, w3, b3))
    assert out3.shape == (B3, S3, H3)
    assert jnp.allclose(out3, ref_embed(ts3, w3, b3), atol=1e-5, rtol=1e-5)

    # --- Test 4: bf16 output path (halves HBM write traffic)
    B4, S4, H4 = 4, 32, 64
    k_t4, k_w4, k_b4 = jax.random.split(jax.random.PRNGKey(3), 3)
    ts4 = jax.random.uniform(k_t4, (B4, S4), dtype=jnp.float32) * 10.0
    w4 = jax.random.uniform(k_w4, (H4, 1), dtype=jnp.float32, minval=-1.0, maxval=1.0)
    b4 = jax.random.uniform(k_b4, (H4,), dtype=jnp.float32, minval=-1.0, maxval=1.0)
    out4 = jax.block_until_ready(
        timestamp_embedding(ts4, w4, b4, out_dtype=jnp.bfloat16))
    assert out4.shape == (B4, S4, H4)
    assert jnp.allclose(out4.astype(jnp.float32), ref_embed(ts4, w4, b4),
                        atol=1e-1, rtol=1e-2)

    print("KERNEL_OK")
</pallas_src>

<mosaic_0001>
module attributes {stable_mosaic.version = 11 : i64} {
  func.func @_timestamp_embed_kernel(%arg0: i32, %arg1: memref<1x16xf32, #tpu.memory_space<vmem>>, %arg2: memref<16x512xf32, #tpu.memory_space<vmem>>, %arg3: memref<1x512xf32, #tpu.memory_space<vmem>>, %arg4: memref<1x512xf32, #tpu.memory_space<vmem>>) attributes {dimension_semantics = [#tpu.dimension_semantics<parallel>], iteration_bounds = array<i64: 1>, scalar_prefetch = 0 : i64, scratch_operands = 0 : i64, tpu.core_type = #tpu.core_type<tc>, window_params = [{transform_indices = @transform_0, window_bounds = array<i64: 1, 16>}, {pipeline_mode = #tpu.pipeline_mode<synchronous>, transform_indices = @transform_1, window_bounds = array<i64: 16, 512>}, {pipeline_mode = #tpu.pipeline_mode<synchronous>, transform_indices = @transform_2, window_bounds = array<i64: 1, 512>}, {transform_indices = @transform_3, window_bounds = array<i64: 1, 512>}]} {
    %c0 = arith.constant 0 : index
    %c0_0 = arith.constant 0 : index
    %0 = vector.load %arg1[%c0, %c0_0] : memref<1x16xf32, #tpu.memory_space<vmem>>, vector<1x16xf32>
    %c0_1 = arith.constant 0 : index
    %c0_2 = arith.constant 0 : index
    %1 = vector.load %arg2[%c0_1, %c0_2] : memref<16x512xf32, #tpu.memory_space<vmem>>, vector<16x512xf32>
    %c0_3 = arith.constant 0 : index
    %c0_4 = arith.constant 0 : index
    %2 = vector.load %arg3[%c0_3, %c0_4] : memref<1x512xf32, #tpu.memory_space<vmem>>, vector<1x512xf32>
    %cst = arith.constant dense<0.000000e+00> : vector<1x512xf32>
    %3 = tpu.matmul %0, %1, %cst {dimension_numbers = #tpu.dot_dimension_numbers<[1], [0], [0], [1], [0, 0, 1, 1], [], []>} : vector<1x16xf32>, vector<16x512xf32>, vector<1x512xf32> -> vector<1x512xf32>
    %4 = arith.addf %3, %2 : vector<1x512xf32>
    %c0_5 = arith.constant 0 : index
    %c0_6 = arith.constant 0 : index
    %5 = vector.load %arg4[%c0_5, %c0_6] : memref<1x512xf32, #tpu.memory_space<vmem>>, vector<1x512xf32>
    tpu.vector_store %arg4[%c0_5, %c0_6], %4 {strides = array<i32>} : memref<1x512xf32, #tpu.memory_space<vmem>>, vector<1x512xf32>,
    return
  }
  func.func @transform_0(%arg0: i32) -> (i32, i32) {
    %c0_i32 = arith.constant 0 : i32
    %c0_i32_0 = arith.constant 0 : i32
    return %arg0, %c0_i32 : i32, i32
  }
  func.func @transform_1(%arg0: i32) -> (i32, i32) {
    %c0_i32 = arith.constant 0 : i32
    %c0_i32_0 = arith.constant 0 : i32
    %c0_i32_1 = arith.constant 0 : i32
    return %c0_i32, %c0_i32_0 : i32, i32
  }
  func.func @transform_2(%arg0: i32) -> (i32, i32) {
    %c0_i32 = arith.constant 0 : i32
    %c0_i32_0 = arith.constant 0 : i32
    %c0_i32_1 = arith.constant 0 : i32
    return %c0_i32, %c0_i32_0 : i32, i32
  }
  func.func @transform_3(%arg0: i32) -> (i32, i32) {
    %c0_i32 = arith.constant 0 : i32
    %c0_i32_0 = arith.constant 0 : i32
    return %arg0, %c0_i32 : i32, i32
  }
}

</mosaic_0001>

<bundles_post_ra>
// kernel: tpu_custom_call.1
= control target key start
LH: loop header
LB: loop body
LE: loop exit
PB: predicated region body
PF: predicated region fallthrough
CT: control target
= control target key end

     0   :  { %8 = vsyncpa [#allocation3], 0  ;;  %s430_s0 = inlined_call_operand.hbm [shape: f32[1,16], index: 0, kind: input, shape index: {}]   ;;  %s431_s1 = inlined_call_operand.hbm [shape: f32[16,512], index: 1, kind: input, shape index: {}]   ;;  %s432_s2 = inlined_call_operand.vmem [shape: f32[1,512], index: 2, kind: input, shape index: {}]   ;;  %s433_s3 = inlined_call_operand.hbm [shape: f32[1,512], index: 3, kind: output, shape index: {}]  }
   0x1   :  { %9 = vsyncpa [#allocation6], 0 }
   0x2   :  { %10 = vsyncpa [#allocation4], 0  ;;  %s357_s12 = smov [#allocation2]   ;;  %s358_s14 = smov [#allocation5]  }
   0x3   :  { %s17_s13 = sshll.u32 %s357_s12, 4  ;;  %s26_s15 = sshll.u32 %s358_s14, 4  ;;  %s18_s13 = int_to_ptr.vmem [resolvable:$true] %s17_s13  ;;  %s384_s15 = int_to_ptr.vmem [resolvable:$true] %s26_s15 }
   0x4   :  { %s285_s18 = scalar_lea.hbm %s430_s0, 16 }
   0x5   :  { %p286_p0 = scmp.ne.s32.totalorder %s430_s0, %s285_s18  ;;  %p289_p1 = scmp.lt.u32.totalorder %s285_s18, %s430_s0 }
   0x7   :  { %p291_p2 = pnand %p289_p1, %p286_p0 }
   0x9   :  { %294 = shalt.err (!%p291_p2)
}
   0xa   :  { %s295_s23 = scalar_lea.vmem %s18_s13, 16  ;;  %s299_s24 = scalar_lea.vmem %s18_s13, 32 }
   0xb   :  { %p296_p3 = scmp.ne.s32.totalorder %s18_s13, %s295_s23  ;;  %p300_p4 = scmp.lt.s32.totalorder %s18_s13, %s18_s13 }
   0xc   :  { %p301_p5 = scmp.lt.s32.totalorder %s299_s24, %s295_s23 }
   0xe   :  { %p302_p6 = por %p301_p5, %p300_p4 }
  0x10   :  { %p303_p7 = pnand %p302_p6, %p296_p3 }
  0x12   :  { %306 = shalt.err (!%p303_p7)
}
  0x13   :  { %20 = dma.hbm_to_vmem [thread:$0]  %s430_s0, 16, %s18_s13, [#allocation3]  }
  0x14   :  { %s307_s29 = scalar_lea.hbm %s431_s1, 1024 }
  0x15   :  { %p308_p8 = scmp.ne.s32.totalorder %s431_s1, %s307_s29  ;;  %p311_p9 = scmp.lt.u32.totalorder %s307_s29, %s431_s1 }
  0x17   :  { %p313_p10 = pnand %p311_p9, %p308_p8 }
  0x19   :  { %316 = shalt.err (!%p313_p10)
}
  0x1a   :  { %s317_s7 = scalar_lea.vmem %s384_s15, 1024  ;;  %p322_p12 = scmp.lt.s32.totalorder %s384_s15, %s384_s15 }
  0x1b   :  { %p318_p11 = scmp.ne.s32.totalorder %s384_s15, %s317_s7  ;;  %p323_p13 = scmp.lt.s32.totalorder %s317_s7, %s317_s7 }
  0x1d   :  { %p324_p0 = por %p323_p13, %p322_p12 }
  0x1f   :  { %p325_p1 = pnand %p324_p0, %p318_p11 }
  0x21   :  { %328 = shalt.err (!%p325_p1)
}
  0x22   :  { %s359_s0 = smov 512   ;;  %s360_s8 = smov 32  }
  0x23   :  { %32 = dma.hbm_to_vmem [thread:$0]  %s431_s1, 1024, %s384_s15, [#allocation6], %s359_s0, %s359_s0, %s360_s8  }
  0x24   :  { %351 = dma.done.wait [#allocation3], 16  }
  0x25   :  { %352 = vsyncadd [#allocation3], 4294967280 }
  0x26   :  { %353 = dma.done.wait [#allocation6], 1024  }
  0x27   :  { %354 = vsyncadd [#allocation6], 4294966272  ;;  %v361_v0 = vmov 0.0   ;;  %v43_v1 = vld [vmem:[#allocation5 + $0x8] sm:$0xff]  ;;  %v45_v3 = vld [vmem:[#allocation5 + $0x18] sm:$0xff]  ;;  %vm72_vm0 = vcmask 130048   ;;  %v52_v14 = vlaneseq }
  0x28   :  { %140 = vmatprep.mubr.f32.mxu0 %v361_v0  ;;  %211 = vmatprep.mubr.f32.mxu1 %v361_v0  ;;  %v47_v2 = vld [vmem:[#allocation5 + $0x28] sm:$0xff]  ;;  %v49_v5 = vld [vmem:[#allocation5 + $0x38] sm:$0xff]  ;;  %v42_v6 = vld [vmem:[#allocation5] sm:$0xff]  ;;  %v362_v20 = vmov 1966171168  }
  0x29   :  { %v270_v4 = vpack.c.bf16 %v47_v2, %v43_v1  ;;  %v46_v7 = vld [vmem:[#allocation5 + $0x20] sm:$0xff]  ;;  %v274_v8 = vpack.c.bf16 %v49_v5, %v45_v3  ;;  %v44_v10 = vld [vmem:[#allocation5 + $0x10] sm:$0xff]  ;;  %v41_v13 = vld [vmem:[#allocation2] sm:$0x1]  ;;  %v53_v15 = vshrl.u32 %v52_v14, 7  ;;  %v225_v21 = vunpack.c.l.s4 %v362_v20 }
  0x2a   :  { %v272_v9 = vpack.c.bf16 %v46_v7, %v42_v6  ;;  %v48_v11 = vld [vmem:[#allocation5 + $0x30] sm:$0xff]  ;;  %vm249_vm1 = vcmp.lt.s32.totalorder %v52_v14, 512 }
  0x2b   :  { %271 = vmatprep.subr.bf16.mxu0 %v270_v4  ;;  %v276_v12 = vpack.c.bf16 %v48_v11, %v44_v10  ;;  %275 = vmatprep.subr.bf16.mxu1 %v274_v8  ;;  %v54_v16 = vsub.s32 0, %v53_v15  ;;  %v50_v17 = vld [vmem:[%s432_s2] sm:$0xf]  ;;  %v62_v18 = vsub.s32 2, %v53_v15  ;;  %v58_v19 = vsub.s32 1, %v53_v15  ;;  %s363_s2 = smov [#allocation7]  }
  0x2c   :  { %273 = vmatpush1.bf16.msra.mxu0 %v272_v9  ;;  %v66_v22 = vsub.s32 3, %v53_v15  ;;  %v226_v26 = vunpack.c.0.s8 %v225_v21  ;;  %s258_s12 = sshll.u32 %s363_s2, 4  ;;  %s259_s12 = int_to_ptr.vmem [resolvable:$true] %s258_s12 }
  0x2d   :  { %277 = vmatpush1.bf16.msra.mxu1 %v276_v12  ;;  %v55_v23 = vrot.slane %v50_v17, %v54_v16  ;;  %v63_v24 = vrot.slane %v50_v17, %v62_v18  ;;  %v59_v25 = vrot.slane %v50_v17, %v58_v19  ;;  %s329_s13 = scalar_lea.vmem %s259_s12, 64  ;;  %p334_p3 = scmp.lt.s32.totalorder %s259_s12, %s259_s12 }
  0x2e   :  { %v67_v27 = vrot.slane %v50_v17, %v66_v22  ;;  %v229_v34 = vsub.s32 %v226_v26, %v53_v15  ;;  %p330_p2 = scmp.ne.s32.totalorder %s259_s12, %s329_s13  ;;  %p335_p4 = scmp.lt.s32.totalorder %s329_s13, %s329_s13 }
  0x2f   :  { %268 = vmatmul.mubr.msk.f32.vlgmr.msra.gmra.mrb[0].mxu0 %vm72_vm0, %v41_v13 }
  0x30   :  { %269 = vmatmul.mubr.msk.f32.vlgmr.msra.gmra.mrb[0].mxu1 %vm72_vm0, %v41_v13  ;;  %p336_p5 = por %p335_p4, %p334_p3 }
  0x32   :  { %p337_p6 = pnand %p336_p5, %p330_p2 }
 0x102   :  { %v142_v28 = vpop.f32.mrb[0].mxu0 }
 0x103   :  { %v143_v29 = vadd.f32 %v142_v28, %v55_v23  ;;  %v213_v30 = vpop.f32.mrb[0].mxu1  ;;  %v144_v31 = vpop.f32.mrb[1].mxu0 }
 0x104   :  { %v214_v32 = vadd.f32 %v213_v30, %v63_v24  ;;  %v145_v33 = vadd.f32 %v144_v31, %v59_v25  ;;  %v215_v35 = vpop.f32.mrb[1].mxu1 }
 0x105   :  { %v216_v36 = vadd.f32 %v215_v35, %v67_v27 }
 0x106   :  { %v222_v37 = vcombine.low %v143_v29, %v145_v33 }
 0x107   :  { %v223_v38 = vcombine.low %v214_v32, %v216_v36 }
 0x108   :  { %v230_v39 = vrot.slane %v222_v37, %v229_v34 }
 0x109   :  { %v237_v40 = vrot.slane %v223_v38, %v229_v34 }
 0x10b   :  { %v238_v41 = vcombine.low %v230_v39, %v237_v40 }
 0x10d   :  { %v245_v42 = vrot.slane %v238_v41, %v229_v34 }
 0x10f   :  { %251 = vst.msk [vmem:[#allocation7] sm:$0xf] %vm249_vm1, %v245_v42 }
 0x110   :  { %340 = shalt.err (!%p337_p6)
}
 0x111   :  { %s341_s16 = scalar_lea.hbm %s433_s3, 64 }
 0x112   :  { %p342_p7 = scmp.ne.s32.totalorder %s433_s3, %s341_s16  ;;  %p345_p8 = scmp.lt.u32.totalorder %s341_s16, %s433_s3 }
 0x114   :  { %p347_p9 = pnand %p345_p8, %p342_p7 }
 0x116   :  { %350 = shalt.err (!%p347_p9)
}
 0x117   :  { %261 = dma.vmem_to_hbm [thread:$0]  %s259_s12, 64, %s433_s3, [#allocation4]  }
 0x118   :  { %355 = dma.done.wait [#allocation4], 64  }
 0x119   :  { %356 = vsyncadd [#allocation4], 4294967232 }
 0x11a   :  { %265 = vsyncpa [#allocation3], 1 }
 0x11b   :  { %266 = vsyncpa [#allocation6], 1 }
 0x11c   :  { %267 = vsyncpa [#allocation4], 1 }

</bundles_post_ra>
